<compile_context>
chip_gen: v7x
topology: tpu7x:2x2x1
jax: 0.10.0
libtpu: 0.0.40
codegen_flags: <defaults>
</compile_context>

<pallas_src>
import jax
import jax.numpy as jnp
from jax.experimental import pallas as pl
from jax.experimental.pallas import tpu as pltpu


def _round_up(x: int, m: int) -> int:
    return ((x + m - 1) // m) * m


def _column_parallel_linear_kernel(x_ref, wt_ref, b_ref, o_ref, acc_ref):
    """One grid step of y = x @ W^T + b, with W pre-transposed to (K, N).

    Grid = (M/tm, N/tn, K/tk), K innermost (reduction axis).  acc_ref is an
    f32 VMEM scratch accumulator resident across the K axis.
    """
    k = pl.program_id(2)

    @pl.when(k == 0)
    def _():
        # Seed the accumulator with the bias (broadcast over the tm rows).
        acc_ref[...] = jnp.broadcast_to(
            b_ref[...].astype(jnp.float32), acc_ref.shape
        )

    # (tm, tk) @ (tk, tn) -> MXU directly, no in-kernel transpose.
    acc_ref[...] += jnp.dot(
        x_ref[...], wt_ref[...], preferred_element_type=jnp.float32
    )

    @pl.when(k == pl.num_programs(2) - 1)
    def _():
        o_ref[...] = acc_ref[...].astype(o_ref.dtype)


def column_parallel_linear(
    x,
    weight,
    bias=None,
    *,
    tm: int = 256,
    tn: int = 256,
    tk: int = 512,
    cast_inputs_to_bf16: bool = False,
):
    """y = x @ weight^T + bias, computed with a tiled Pallas matmul kernel.

    Args:
        x:      (..., in_features)
        weight: (out_features, in_features)     (PyTorch F.linear layout)
        bias:   (out_features,) or None
        tm/tn/tk: tile sizes (clamped & aligned to hardware tiling internally)
        cast_inputs_to_bf16: optionally cast x/W to bf16 for the MXU (useful on
            v5e where f32 matmul is slow); accumulation stays f32.

    Returns:
        (..., out_features), same dtype as x.
    """
    *lead, k_dim = x.shape
    n_dim, k_dim_w = weight.shape
    assert k_dim == k_dim_w, f"in_features mismatch: {k_dim} vs {k_dim_w}"
    m_dim = 1
    for d in lead:
        m_dim *= d

    out_dtype = x.dtype

    x2d = x.reshape(m_dim, k_dim)
    # Pre-transpose the weight once in the wrapper: (N, K) -> (K, N).
    w_t = weight.T
    if bias is None:
        bias = jnp.zeros((n_dim,), dtype=out_dtype)
    bias2d = bias.reshape(1, n_dim)

    if cast_inputs_to_bf16:
        x2d = x2d.astype(jnp.bfloat16)
        w_t = w_t.astype(jnp.bfloat16)

    # ---- tile selection (aligned to (8, 128) hardware tiling) ----
    tm_ = min(tm, _round_up(m_dim, 8))      # sublane axis: multiple of 8
    tn_ = min(tn, _round_up(n_dim, 128))    # lane axis:    multiple of 128
    tk_ = min(tk, _round_up(k_dim, 128))    # lane/sublane: multiple of 128
    tm_ = _round_up(tm_, 8)
    tn_ = _round_up(tn_, 128)
    tk_ = _round_up(tk_, 128)

    # ---- pad to tile multiples instead of asserting divisibility ----
    m_pad = _round_up(m_dim, tm_)
    n_pad = _round_up(n_dim, tn_)
    k_pad = _round_up(k_dim, tk_)
    if (m_pad, k_pad) != (m_dim, k_dim):
        x2d = jnp.pad(x2d, ((0, m_pad - m_dim), (0, k_pad - k_dim)))
    if (k_pad, n_pad) != (k_dim, n_dim):
        w_t = jnp.pad(w_t, ((0, k_pad - k_dim), (0, n_pad - n_dim)))
    if n_pad != n_dim:
        bias2d = jnp.pad(bias2d, ((0, 0), (0, n_pad - n_dim)))

    grid = (m_pad // tm_, n_pad // tn_, k_pad // tk_)

    # ---- explicit VMEM budget (double-buffered in/out tiles + f32 acc) ----
    in_bytes = jnp.dtype(x2d.dtype).itemsize
    out_bytes = jnp.dtype(out_dtype).itemsize
    vmem_est = (
        2 * (tm_ * tk_ + tk_ * tn_) * in_bytes   # double-buffered x / W^T tiles
        + 2 * tn_ * in_bytes                     # bias tile (tiny)
        + 2 * tm_ * tn_ * out_bytes              # double-buffered output tile
        + tm_ * tn_ * 4                          # f32 accumulator scratch
    )
    # Headroom (2x) but capped well below v7x's 64 MiB physical VMEM.
    vmem_limit = int(min(max(2 * vmem_est, 32 << 20), 48 << 20))

    out = pl.pallas_call(
        _column_parallel_linear_kernel,
        out_shape=jax.ShapeDtypeStruct((m_pad, n_pad), out_dtype),
        grid_spec=pltpu.PrefetchScalarGridSpec(
            num_scalar_prefetch=0,
            grid=grid,
            in_specs=[
                pl.BlockSpec((tm_, tk_), lambda i, j, k: (i, k)),  # x tile
                pl.BlockSpec((tk_, tn_), lambda i, j, k: (k, j)),  # W^T tile
                pl.BlockSpec((1, tn_), lambda i, j, k: (0, j)),    # bias tile
            ],
            out_specs=pl.BlockSpec((tm_, tn_), lambda i, j, k: (i, j)),
            scratch_shapes=[pltpu.VMEM((tm_, tn_), jnp.float32)],
        ),
        compiler_params=pltpu.CompilerParams(
            dimension_semantics=("parallel", "parallel", "arbitrary"),
            vmem_limit_bytes=vmem_limit,
        ),
    )(x2d, w_t, bias2d)

    out = out[:m_dim, :n_dim]
    return out.reshape(*lead, n_dim)


def init_column_parallel_linear_params(key, in_features, out_features, dtype=jnp.float32):
    """Deterministic parameter init matching ColumnParallelLinear.__init__
    with world_size == 1: xavier_normal weight, zero bias."""
    std = (2.0 / (in_features + out_features)) ** 0.5
    weight = std * jax.random.normal(key, (out_features, in_features), dtype=dtype)
    bias = jnp.zeros((out_features,), dtype=dtype)
    return weight, bias


if __name__ == "__main__":
    # TODO(synk): mp_copy / mp_gather are distributed collectives; with
    # world_size == 1 they are identity in the forward pass, so only the
    # F.linear math is implemented as a kernel here.
    key = jax.random.PRNGKey(0)
    kx, kw = jax.random.split(key)

    batch, seq = 2, 8
    in_features, out_features = 128, 256

    x = jax.random.normal(kx, (batch, seq, in_features), dtype=jnp.float32)
    weight, bias = init_column_parallel_linear_params(kw, in_features, out_features)

    y = column_parallel_linear(x, weight, bias)
    y = jax.block_until_ready(y)

    # Reference check against plain JAX (same math as F.linear).
    y_ref = x @ weight.T + bias
    assert y.shape == (batch, seq, out_features)
    assert jnp.allclose(y, y_ref, atol=1e-4, rtol=1e-4)

    # Also exercise the padding path (M/N/K not multiples of the tiles).
    kx2, kw2 = jax.random.split(kw)
    x2 = jax.random.normal(kx2, (3, 5, 96), dtype=jnp.float32)
    w2, b2 = init_column_parallel_linear_params(kw2, 96, 200)
    y2 = jax.block_until_ready(column_parallel_linear(x2, w2, b2))
    y2_ref = x2 @ w2.T + b2
    assert y2.shape == (3, 5, 200)
    assert jnp.allclose(y2, y2_ref, atol=1e-4, rtol=1e-4)

    print("KERNEL_OK")
</pallas_src>

<mosaic_0001>
module attributes {stable_mosaic.version = 11 : i64} {
  func.func @_column_parallel_linear_kernel(%arg0: i32, %arg1: i32, %arg2: i32, %arg3: memref<16x128xf32, #tpu.memory_space<vmem>>, %arg4: memref<128x256xf32, #tpu.memory_space<vmem>>, %arg5: memref<1x256xf32, #tpu.memory_space<vmem>>, %arg6: memref<16x256xf32, #tpu.memory_space<vmem>>, %arg7: memref<16x256xf32, #tpu.memory_space<vmem>>) attributes {dimension_semantics = [#tpu.dimension_semantics<parallel>, #tpu.dimension_semantics<parallel>, #tpu.dimension_semantics<arbitrary>], iteration_bounds = array<i64: 1, 1, 1>, scalar_prefetch = 0 : i64, scratch_operands = 1 : i64, tpu.core_type = #tpu.core_type<tc>, window_params = [{transform_indices = @transform_0, window_bounds = array<i64: 16, 128>}, {transform_indices = @transform_1, window_bounds = array<i64: 128, 256>}, {transform_indices = @transform_2, window_bounds = array<i64: 1, 256>}, {transform_indices = @transform_3, window_bounds = array<i64: 16, 256>}]} {
    %c0_i32 = arith.constant 0 : i32
    %0 = arith.cmpi eq, %arg2, %c0_i32 : i32
    %1 = arith.extui %0 : i1 to i32
    %c0_i32_0 = arith.constant 0 : i32
    %2 = arith.cmpi ne, %1, %c0_i32_0 : i32
    scf.if %2 {
      %c0_10 = arith.constant 0 : index
      %c0_11 = arith.constant 0 : index
      %12 = vector.load %arg5[%c0_10, %c0_11] : memref<1x256xf32, #tpu.memory_space<vmem>>, vector<1x256xf32>
      %13 = vector.shape_cast %12 : vector<1x256xf32> to vector<1x256xf32>
      %14 = vector.broadcast %13 : vector<1x256xf32> to vector<16x256xf32>
      %c0_12 = arith.constant 0 : index
      %c0_13 = arith.constant 0 : index
      %15 = vector.load %arg7[%c0_12, %c0_13] : memref<16x256xf32, #tpu.memory_space<vmem>>, vector<16x256xf32>
      tpu.vector_store %arg7[%c0_12, %c0_13], %14 {strides = array<i32>} : memref<16x256xf32, #tpu.memory_space<vmem>>, vector<16x256xf32>,
    } else {
    }
    %c0 = arith.constant 0 : index
    %c0_1 = arith.constant 0 : index
    %3 = vector.load %arg7[%c0, %c0_1] : memref<16x256xf32, #tpu.memory_space<vmem>>, vector<16x256xf32>
    %c0_2 = arith.constant 0 : index
    %c0_3 = arith.constant 0 : index
    %4 = vector.load %arg3[%c0_2, %c0_3] : memref<16x128xf32, #tpu.memory_space<vmem>>, vector<16x128xf32>
    %c0_4 = arith.constant 0 : index
    %c0_5 = arith.constant 0 : index
    %5 = vector.load %arg4[%c0_4, %c0_5] : memref<128x256xf32, #tpu.memory_space<vmem>>, vector<128x256xf32>
    %cst = arith.constant dense<0.000000e+00> : vector<16x256xf32>
    %6 = tpu.matmul %4, %5, %cst {dimension_numbers = #tpu.dot_dimension_numbers<[1], [0], [0], [1], [0, 0, 1, 1], [], []>} : vector<16x128xf32>, vector<128x256xf32>, vector<16x256xf32> -> vector<16x256xf32>
    %7 = arith.addf %3, %6 : vector<16x256xf32>
    %c0_6 = arith.constant 0 : index
    %c0_7 = arith.constant 0 : index
    %8 = vector.load %arg7[%c0_6, %c0_7] : memref<16x256xf32, #tpu.memory_space<vmem>>, vector<16x256xf32>
    tpu.vector_store %arg7[%c0_6, %c0_7], %7 {strides = array<i32>} : memref<16x256xf32, #tpu.memory_space<vmem>>, vector<16x256xf32>,
    %c0_i32_8 = arith.constant 0 : i32
    %9 = arith.cmpi eq, %arg2, %c0_i32_8 : i32
    %10 = arith.extui %9 : i1 to i32
    %c0_i32_9 = arith.constant 0 : i32
    %11 = arith.cmpi ne, %10, %c0_i32_9 : i32
    scf.if %11 {
      %c0_10 = arith.constant 0 : index
      %c0_11 = arith.constant 0 : index
      %12 = vector.load %arg7[%c0_10, %c0_11] : memref<16x256xf32, #tpu.memory_space<vmem>>, vector<16x256xf32>
      %c0_12 = arith.constant 0 : index
      %c0_13 = arith.constant 0 : index
      %13 = vector.load %arg6[%c0_12, %c0_13] : memref<16x256xf32, #tpu.memory_space<vmem>>, vector<16x256xf32>
      tpu.vector_store %arg6[%c0_12, %c0_13], %12 {strides = array<i32>} : memref<16x256xf32, #tpu.memory_space<vmem>>, vector<16x256xf32>,
    } else {
    }
    return
  }
  func.func @transform_0(%arg0: i32, %arg1: i32, %arg2: i32) -> (i32, i32) {
    %c0_i32 = arith.constant 0 : i32
    return %arg0, %arg2 : i32, i32
  }
  func.func @transform_1(%arg0: i32, %arg1: i32, %arg2: i32) -> (i32, i32) {
    %c0_i32 = arith.constant 0 : i32
    return %arg2, %arg1 : i32, i32
  }
  func.func @transform_2(%arg0: i32, %arg1: i32, %arg2: i32) -> (i32, i32) {
    %c0_i32 = arith.constant 0 : i32
    %c0_i32_0 = arith.constant 0 : i32
    return %c0_i32, %arg1 : i32, i32
  }
  func.func @transform_3(%arg0: i32, %arg1: i32, %arg2: i32) -> (i32, i32) {
    %c0_i32 = arith.constant 0 : i32
    return %arg0, %arg1 : i32, i32
  }
}

</mosaic_0001>

<bundles_post_ra>
// kernel: tpu_custom_call.1
= control target key start
LH: loop header
LB: loop body
LE: loop exit
PB: predicated region body
PF: predicated region fallthrough
CT: control target
= control target key end

     0   :  { %8 = vsyncpa [#allocation4], 0  ;;  %s416_s0 = inlined_call_operand.hbm [shape: f32[16,128], index: 0, kind: input, shape index: {}]   ;;  %s417_s1 = inlined_call_operand.hbm [shape: f32[128,256], index: 1, kind: input, shape index: {}]   ;;  %s418_s2 = inlined_call_operand.vmem [shape: f32[1,256], index: 2, kind: input, shape index: {}]   ;;  %s419_s3 = inlined_call_operand.hbm [shape: f32[16,256], index: 3, kind: output, shape index: {}]  }
   0x1   :  { %9 = vsyncpa [#allocation7], 0 }
   0x2   :  { %10 = vsyncpa [#allocation5], 0  ;;  %s343_s12 = smov [#allocation3]   ;;  %s271_s16 = scalar_lea.hbm %s416_s0, 256 }
   0x3   :  { %s16_s13 = sshll.u32 %s343_s12, 4  ;;  %p272_p0 = scmp.ne.s32.totalorder %s416_s0, %s271_s16  ;;  %s17_s13 = int_to_ptr.vmem [resolvable:$true] %s16_s13 }
   0x4   :  { %p275_p1 = scmp.lt.u32.totalorder %s271_s16, %s416_s0 }
   0x6   :  { %p277_p2 = pnand %p275_p1, %p272_p0 }
   0x8   :  { %280 = shalt.err (!%p277_p2)
}
   0x9   :  { %s281_s21 = scalar_lea.vmem %s17_s13, 256  ;;  %p286_p4 = scmp.lt.s32.totalorder %s17_s13, %s17_s13 }
   0xa   :  { %p282_p3 = scmp.ne.s32.totalorder %s17_s13, %s281_s21  ;;  %p287_p5 = scmp.lt.s32.totalorder %s281_s21, %s281_s21 }
   0xc   :  { %p288_p6 = por %p287_p5, %p286_p4 }
   0xe   :  { %p289_p7 = pnand %p288_p6, %p282_p3 }
  0x10   :  { %292 = shalt.err (!%p289_p7)
}
  0x11   :  { %s344_s22 = smov 128   ;;  %s345_s23 = smov 8  }
  0x12   :  { %22 = dma.hbm_to_vmem [thread:$0]  %s416_s0, 256, %s17_s13, [#allocation4], %s344_s22, %s344_s22, %s345_s23  }
  0x13   :  { %s346_s26 = smov [#allocation6]   ;;  %s293_s30 = scalar_lea.hbm %s417_s1, 4096 }
  0x14   :  { %s28_s27 = sshll.u32 %s346_s26, 4  ;;  %p294_p8 = scmp.ne.s32.totalorder %s417_s1, %s293_s30  ;;  %s29_s27 = int_to_ptr.vmem [resolvable:$true] %s28_s27 }
  0x15   :  { %p297_p9 = scmp.lt.u32.totalorder %s293_s30, %s417_s1 }
  0x17   :  { %p299_p10 = pnand %p297_p9, %p294_p8 }
  0x19   :  { %302 = shalt.err (!%p299_p10)
}
  0x1a   :  { %s303_s8 = scalar_lea.vmem %s29_s27, 4096  ;;  %p308_p12 = scmp.lt.s32.totalorder %s29_s27, %s29_s27 }
  0x1b   :  { %p304_p11 = scmp.ne.s32.totalorder %s29_s27, %s303_s8  ;;  %p309_p13 = scmp.lt.s32.totalorder %s303_s8, %s303_s8 }
  0x1d   :  { %p310_p0 = por %p309_p13, %p308_p12 }
  0x1f   :  { %p311_p1 = pnand %p310_p0, %p304_p11 }
  0x21   :  { %314 = shalt.err (!%p311_p1)
}
  0x22   :  { %s347_s0 = smov 256   ;;  %s348_s9 = smov 16  }
  0x23   :  { %34 = dma.hbm_to_vmem [thread:$0]  %s417_s1, 4096, %s29_s27, [#allocation7], %s347_s0, %s347_s0, %s348_s9  }
  0x24   :  { %337 = dma.done.wait [#allocation4], 256  }
  0x25   :  { %338 = vsyncadd [#allocation4], 4294967040 }
  0x26   :  { %339 = dma.done.wait [#allocation7], 4096  }
  0x27   :  { %340 = vsyncadd [#allocation7], 4294963200  ;;  %v349_v0 = vmov 0.0   ;;  %v70_v1 = vld [vmem:[#allocation6 + $0x8] sm:$0xff]  ;;  %v72_v2 = vld [vmem:[#allocation6 + $0x18] sm:$0xff]  ;;  %v49_v51 = vlaneseq  ;;  %s350_s13 = smov [#allocation8]  }
  0x28   :  { %165 = vmatprep.mubr.f32.mxu0 %v349_v0  ;;  %171 = vmatprep.mubr.f32.mxu1 %v349_v0  ;;  %v69_v3 = vld [vmem:[#allocation6] sm:$0xff]  ;;  %v215_v4 = vpack.c.bf16 %v72_v2, %v70_v1  ;;  %v71_v5 = vld [vmem:[#allocation6 + $0x10] sm:$0xff]  ;;  %v74_v6 = vld [vmem:[#allocation6 + $0x28] sm:$0xff]  ;;  %s202_s14 = sshll.u32 %s350_s13, 4  ;;  %s203_s14 = int_to_ptr.vmem [resolvable:$true] %s202_s14 }
  0x29   :  { %v76_v7 = vld [vmem:[#allocation6 + $0x38] sm:$0xff]  ;;  %v217_v8 = vpack.c.bf16 %v71_v5, %v69_v3  ;;  %v73_v10 = vld [vmem:[#allocation6 + $0x20] sm:$0xff]  ;;  %v75_v11 = vld [vmem:[#allocation6 + $0x30] sm:$0xff]  ;;  %v50_v52 = vshrl.u32 %v49_v51, 7  ;;  %s315_s15 = scalar_lea.vmem %s203_s14, 512  ;;  %p320_p3 = scmp.lt.s32.totalorder %s203_s14, %s203_s14 }
  0x2a   :  { %v219_v9 = vpack.c.bf16 %v76_v7, %v74_v6  ;;  %v78_v12 = vld [vmem:[#allocation6 + $0x48] sm:$0xff]  ;;  %216 = vmatprep.subr.bf16.mxu0 %v215_v4  ;;  %247 = vmatprep.subr.bf16.mxu1 %v215_v4  ;;  %v80_v13 = vld [vmem:[#allocation6 + $0x58] sm:$0xff]  ;;  %v221_v14 = vpack.c.bf16 %v75_v11, %v73_v10  ;;  %v77_v16 = vld [vmem:[#allocation6 + $0x40] sm:$0xff]  ;;  %p316_p2 = scmp.ne.s32.totalorder %s203_s14, %s315_s15  ;;  %p321_p4 = scmp.lt.s32.totalorder %s315_s15, %s315_s15 }
  0x2b   :  { %218 = vmatpush1.bf16.msra.mxu0 %v217_v8  ;;  %255 = vmatpush1.bf16.msra.mxu1 %v217_v8  ;;  %v223_v15 = vpack.c.bf16 %v80_v13, %v78_v12  ;;  %v79_v17 = vld [vmem:[#allocation6 + $0x50] sm:$0xff]  ;;  %v82_v18 = vld [vmem:[#allocation6 + $0x68] sm:$0xff]  ;;  %v84_v19 = vld [vmem:[#allocation6 + $0x78] sm:$0xff]  ;;  %v51_v53 = vsub.s32 0, %v50_v52  ;;  %v55_v55 = vsub.s32 1, %v50_v52 }
  0x2c   :  { %220 = vmatprep.subr.bf16.mxu0 %v219_v9  ;;  %248 = vmatprep.subr.bf16.mxu1 %v219_v9  ;;  %v225_v20 = vpack.c.bf16 %v79_v17, %v77_v16  ;;  %v227_v21 = vpack.c.bf16 %v84_v19, %v82_v18  ;;  %v81_v22 = vld [vmem:[#allocation6 + $0x60] sm:$0xff]  ;;  %v83_v23 = vld [vmem:[#allocation6 + $0x70] sm:$0xff]  ;;  %v86_v24 = vld [vmem:[#allocation6 + $0x88] sm:$0xff]  ;;  %p322_p5 = por %p321_p4, %p320_p3 }
  0x2d   :  { %v88_v25 = vld [vmem:[#allocation6 + $0x98] sm:$0xff]  ;;  %v229_v26 = vpack.c.bf16 %v83_v23, %v81_v22  ;;  %v85_v28 = vld [vmem:[#allocation6 + $0x80] sm:$0xff]  ;;  %v87_v29 = vld [vmem:[#allocation6 + $0x90] sm:$0xff] }
  0x2e   :  { %v231_v27 = vpack.c.bf16 %v88_v25, %v86_v24  ;;  %v90_v30 = vld [vmem:[#allocation6 + $0xa8] sm:$0xff]  ;;  %v92_v31 = vld [vmem:[#allocation6 + $0xb8] sm:$0xff]  ;;  %v233_v32 = vpack.c.bf16 %v87_v29, %v85_v28  ;;  %v89_v34 = vld [vmem:[#allocation6 + $0xa0] sm:$0xff]  ;;  %p323_p6 = pnand %p322_p5, %p316_p2 }
  0x2f   :  { %222 = vmatpush1.bf16.msra.mxu0 %v221_v14  ;;  %256 = vmatpush1.bf16.msra.mxu1 %v221_v14  ;;  %v235_v33 = vpack.c.bf16 %v92_v31, %v90_v30  ;;  %v91_v35 = vld [vmem:[#allocation6 + $0xb0] sm:$0xff]  ;;  %v94_v36 = vld [vmem:[#allocation6 + $0xc8] sm:$0xff]  ;;  %v96_v37 = vld [vmem:[#allocation6 + $0xd8] sm:$0xff] }
  0x30   :  { %224 = vmatprep.subr.bf16.mxu0 %v223_v15  ;;  %249 = vmatprep.subr.bf16.mxu1 %v223_v15  ;;  %v237_v38 = vpack.c.bf16 %v91_v35, %v89_v34  ;;  %v239_v39 = vpack.c.bf16 %v96_v37, %v94_v36  ;;  %v93_v40 = vld [vmem:[#allocation6 + $0xc0] sm:$0xff]  ;;  %v95_v41 = vld [vmem:[#allocation6 + $0xd0] sm:$0xff]  ;;  %v98_v42 = vld [vmem:[#allocation6 + $0xe8] sm:$0xff] }
  0x31   :  { %v100_v43 = vld [vmem:[#allocation6 + $0xf8] sm:$0xff]  ;;  %v241_v44 = vpack.c.bf16 %v95_v41, %v93_v40  ;;  %v97_v46 = vld [vmem:[#allocation6 + $0xe0] sm:$0xff]  ;;  %v99_v47 = vld [vmem:[#allocation6 + $0xf0] sm:$0xff] }
  0x32   :  { %v243_v45 = vpack.c.bf16 %v100_v43, %v98_v42  ;;  %v245_v48 = vpack.c.bf16 %v99_v47, %v97_v46  ;;  %v67_v49 = vld [vmem:[#allocation3] sm:$0xff]  ;;  %v68_v50 = vld [vmem:[#allocation3 + $0x8] sm:$0xff] }
  0x33   :  { %226 = vmatpush1.bf16.msra.mxu0 %v225_v20  ;;  %257 = vmatpush1.bf16.msra.mxu1 %v225_v20  ;;  %v47_v54 = vld [vmem:[%s418_s2] sm:$0x3] }
  0x34   :  { %228 = vmatprep.subr.bf16.mxu0 %v227_v21  ;;  %250 = vmatprep.subr.bf16.mxu1 %v227_v21  ;;  %v52_v56 = vrot.slane %v47_v54, %v51_v53  ;;  %v56_v57 = vrot.slane %v47_v54, %v55_v55 }
  0x37   :  { %230 = vmatpush1.bf16.msra.mxu0 %v229_v26  ;;  %258 = vmatpush1.bf16.msra.mxu1 %v229_v26 }
  0x38   :  { %232 = vmatprep.subr.bf16.mxu0 %v231_v27  ;;  %251 = vmatprep.subr.bf16.mxu1 %v231_v27 }
  0x3b   :  { %234 = vmatpush1.bf16.msra.mxu0 %v233_v32  ;;  %259 = vmatpush1.bf16.msra.mxu1 %v233_v32 }
  0x3c   :  { %236 = vmatprep.subr.bf16.mxu0 %v235_v33  ;;  %252 = vmatprep.subr.bf16.mxu1 %v235_v33 }
  0x3f   :  { %238 = vmatpush1.bf16.msra.mxu0 %v237_v38  ;;  %260 = vmatpush1.bf16.msra.mxu1 %v237_v38 }
  0x40   :  { %240 = vmatprep.subr.bf16.mxu0 %v239_v39  ;;  %253 = vmatprep.subr.bf16.mxu1 %v239_v39 }
  0x43   :  { %242 = vmatpush1.bf16.msra.mxu0 %v241_v44  ;;  %261 = vmatpush1.bf16.msra.mxu1 %v241_v44 }
  0x44   :  { %244 = vmatprep.subr.bf16.mxu0 %v243_v45  ;;  %254 = vmatprep.subr.bf16.mxu1 %v243_v45 }
  0x47   :  { %246 = vmatpush1.bf16.msra.mxu0 %v245_v48  ;;  %262 = vmatpush1.bf16.msra.mxu1 %v245_v48 }
  0x4a   :  { %166 = vmatmul.mubr.f32.vlgmr.msra.gmra.mrb[0].mxu0 %v67_v49  ;;  %172 = vmatmul.mubr.f32.vlgmr.msra.gmra.mrb[0].mxu1 %v68_v50 }
 0x11d   :  { %v167_v58 = vpop.f32.mrb[0].mxu0  ;;  %v173_v59 = vpop.f32.mrb[0].mxu1 }
 0x11e   :  { %v178_v60 = vadd.f32 %v167_v58, %v52_v56  ;;  %v180_v61 = vadd.f32 %v173_v59, %v52_v56  ;;  %v169_v62 = vpop.f32.mrb[1].mxu0  ;;  %v175_v63 = vpop.f32.mrb[1].mxu1 }
 0x11f   :  { %v179_v0 = vadd.f32 %v169_v62, %v56_v57  ;;  %v181_v1 = vadd.f32 %v175_v63, %v56_v57 }
 0x120   :  { %193 = vst [vmem:[#allocation8] sm:$0xff] %v178_v60  ;;  %195 = vst [vmem:[#allocation8 + $0x10] sm:$0xff] %v180_v61 }
 0x121   :  { %194 = vst [vmem:[#allocation8 + $0x8] sm:$0xff] %v179_v0  ;;  %196 = vst [vmem:[#allocation8 + $0x18] sm:$0xff] %v181_v1 }
 0x122   :  { %326 = shalt.err (!%p323_p6)
}
 0x123   :  { %s327_s17 = scalar_lea.hbm %s419_s3, 512 }
 0x124   :  { %p328_p7 = scmp.ne.s32.totalorder %s419_s3, %s327_s17  ;;  %p331_p8 = scmp.lt.u32.totalorder %s327_s17, %s419_s3 }
 0x126   :  { %p333_p9 = pnand %p331_p8, %p328_p7 }
 0x128   :  { %336 = shalt.err (!%p333_p9)
}
 0x129   :  { %208 = dma.vmem_to_hbm [thread:$0]  %s203_s14, 512, %s419_s3, [#allocation5], %s347_s0, %s347_s0, %s348_s9  }
 0x12a   :  { %341 = dma.done.wait [#allocation5], 512  }
 0x12b   :  { %342 = vsyncadd [#allocation5], 4294966784 }
 0x12c   :  { %212 = vsyncpa [#allocation4], 1 }
 0x12d   :  { %213 = vsyncpa [#allocation7], 1 }
 0x12e   :  { %214 = vsyncpa [#allocation5], 1 }

</bundles_post_ra>
